<compile_context>
chip_gen: v6e
topology: v6e:2x2x1
jax: 0.10.0
libtpu: 0.0.40
codegen_flags: <defaults>
</compile_context>

<pallas_src>
import functools

import jax
import jax.numpy as jnp
import numpy as np
from jax.experimental import pallas as pl
from jax.experimental.pallas import tpu as pltpu


_COMPUTE_DTYPE = jnp.bfloat16
# Use the mean-folded (N x pre-tiled, 1/N pre-scaled) fc1 weight only while it
# stays small; above this it blows up VMEM residency and per-call HBM weight
# traffic (it is N x the true fc1 weight).
_FOLD_WEIGHT_BYTES_MAX = 4 * 1024 * 1024
_VMEM_CAP_BYTES = 64 * 1024 * 1024  # v7x physical VMEM per TensorCore


def _round_up(x, m):
    return ((x + m - 1) // m) * m


def _folded_kernel(seqf_ref, seqef_ref, src_ref, w1_ref, b_ref, w2_ref, o_ref,
                   *, nf, ne):
    """z = fc2(relu(seq_flat@w_seq + seqe_flat@w_e + src@w_src + b1)) + b2.

    The mean over N is folded into the pre-tiled, 1/N-prescaled fc1 weight, so
    the whole first layer is three MXU contractions over one packed weight.
    Row offsets nf and nf+ne are 16-aligned (bf16 sublane tile), so the static
    slices below are zero-cost Ref views.
    """
    h = (jnp.dot(seqf_ref[...], w1_ref[:nf, :],
                 preferred_element_type=jnp.float32)            # K = N*F
         + jnp.dot(seqef_ref[...], w1_ref[nf:nf + ne, :],
                   preferred_element_type=jnp.float32)          # K = N*E
         + jnp.dot(src_ref[...], w1_ref[nf + ne:, :],
                   preferred_element_type=jnp.float32)          # K = F
         + b_ref[0:1, :])                                       # fc1 bias (f32)
    h = jnp.maximum(h, 0.0).astype(w2_ref.dtype)                # ReLU, -> bf16
    o_ref[...] = (jnp.dot(h, w2_ref[...], preferred_element_type=jnp.float32)
                  + b_ref[1:2, :]).astype(o_ref.dtype)


def _mean_kernel(seq_ref, seqe_ref, src_ref, w1_ref, b_ref, w2_ref, o_ref,
                 *, f, e):
    """Fallback for large N/F: mean(N) on the XLU, fc1 uses the true weight."""
    inv_n = 1.0 / seq_ref.shape[1]
    hn_f = (jnp.sum(seq_ref[...], axis=1, dtype=jnp.float32) * inv_n
            ).astype(w1_ref.dtype)
    hn_e = (jnp.sum(seqe_ref[...], axis=1, dtype=jnp.float32) * inv_n
            ).astype(w1_ref.dtype)
    h = (jnp.dot(hn_f, w1_ref[:f, :], preferred_element_type=jnp.float32)
         + jnp.dot(hn_e, w1_ref[f:f + e, :], preferred_element_type=jnp.float32)
         + jnp.dot(src_ref[...], w1_ref[f + e:, :],
                   preferred_element_type=jnp.float32)
         + b_ref[0:1, :])
    h = jnp.maximum(h, 0.0).astype(w2_ref.dtype)
    o_ref[...] = (jnp.dot(h, w2_ref[...], preferred_element_type=jnp.float32)
                  + b_ref[1:2, :]).astype(o_ref.dtype)


def prepare_mean_pool_params(w1_t, b1, w2_t, b2, feat_dim, edge_dim, n_neighbors):
    """One-time weight prep (module init). Do NOT call per forward: it would
    materialize the N x-inflated folded fc1 weight in HBM on every call."""
    F, E, N = feat_dim, edge_dim, n_neighbors
    assert w1_t.shape == (2 * F + E, F) and w2_t.shape == (F, F)

    itemsize = np.dtype(_COMPUTE_DTYPE).itemsize
    fold = (N * (F + E) + F) * F * itemsize <= _FOLD_WEIGHT_BYTES_MAX

    # Both biases packed into one [2, F] f32 array (added post-accumulation).
    b_packed = jnp.stack([b1, b2]).astype(jnp.float32)
    w2_c = w2_t.astype(_COMPUTE_DTYPE)

    if fold:
        # Zero-cost in-kernel Ref slices of the packed weight need 16-row
        # (bf16 sublane tile) aligned offsets. Keep these asserts.
        assert (N * F) % 16 == 0 and (N * E) % 16 == 0
        inv_n = 1.0 / N
        w_seq = jnp.tile(w1_t[:F, :], (N, 1)) * inv_n              # [N*F, F]
        w_e = jnp.tile(w1_t[F:F + E, :], (N, 1)) * inv_n           # [N*E, F]
        w1_c = jnp.concatenate([w_seq, w_e, w1_t[F + E:, :]],
                               axis=0).astype(_COMPUTE_DTYPE)      # [N(F+E)+F, F]
    else:
        assert F % 16 == 0 and (F + E) % 16 == 0
        w1_c = w1_t.astype(_COMPUTE_DTYPE)                         # [2F+E, F]

    return {"w1": w1_c, "b": b_packed, "w2": w2_c}


def mean_pool_forward(src, seq, seq_e, params):
    """Pallas forward for MeanPool: returns ((z, z_walk=None), None)."""
    B, N, F = seq.shape
    E = seq_e.shape[-1]
    w1, b, w2 = params["w1"], params["b"], params["w2"]
    cdt = w1.dtype
    # Folded (pre-tiled) weight vs. true weight is recoverable from its shape.
    folded = (w1.shape[0] == N * (F + E) + F) and N > 1

    src_c = src.astype(cdt)

    # Block over batch only. Aim for >= 2 grid steps once B allows it (shards
    # the "parallel" axis across v7x's two TensorCores and overlaps the i+1
    # DMA with step i compute); 16-row blocks keep bf16 sublane tiling happy.
    if B <= 16:
        block_b = B
    else:
        block_b = min(512, _round_up(pl.cdiv(B, 2), 16))
    grid = (pl.cdiv(B, block_b),)
    # When B % block_b != 0 the last block's padded input rows are
    # uninitialized; that is safe because the corresponding output rows are
    # masked off by the partial output store and never written.

    out_shape = jax.ShapeDtypeStruct((B, F), jnp.float32)
    out_spec = pl.BlockSpec((block_b, F), lambda i: (i, 0))
    # NOTE: the three constant-index weight operands are double-buffered by the
    # default pipeliner even though never re-fetched; negligible at these
    # sizes. For very large folded weights, stage them once (manual DMA /
    # Buffered(1)) before raising block_b on v7x's 64 MiB VMEM.
    w1_spec = pl.BlockSpec(w1.shape, lambda i: (0, 0))
    b_spec = pl.BlockSpec(b.shape, lambda i: (0, 0))
    w2_spec = pl.BlockSpec(w2.shape, lambda i: (0, 0))

    if folded:
        # Flatten sequence dims (contiguous, free) so the mean rides the MXU.
        seqf = seq.reshape(B, N * F).astype(cdt)
        seqef = seq_e.reshape(B, N * E).astype(cdt)
        kernel = functools.partial(_folded_kernel, nf=N * F, ne=N * E)
        in_specs = [
            pl.BlockSpec((block_b, N * F), lambda i: (i, 0)),
            pl.BlockSpec((block_b, N * E), lambda i: (i, 0)),
            pl.BlockSpec((block_b, F), lambda i: (i, 0)),
            w1_spec, b_spec, w2_spec,
        ]
        inputs = (seqf, seqef, src_c, w1, b, w2)
    else:
        seq_c = seq.astype(cdt)
        seqe_c = seq_e.astype(cdt)
        kernel = functools.partial(_mean_kernel, f=F, e=E)
        in_specs = [
            pl.BlockSpec((block_b, N, F), lambda i: (i, 0, 0)),
            pl.BlockSpec((block_b, N, E), lambda i: (i, 0, 0)),
            pl.BlockSpec((block_b, F), lambda i: (i, 0)),
            w1_spec, b_spec, w2_spec,
        ]
        inputs = (seq_c, seqe_c, src_c, w1, b, w2)

    itemsize = np.dtype(cdt).itemsize
    weight_bytes = (w1.size + w2.size) * itemsize + b.size * 4
    in_block_bytes = block_b * (N * F + N * E + F) * itemsize
    out_block_bytes = block_b * F * 4
    # 2x double-buffered streaming blocks + 2x (default-pipelined) weights.
    vmem_need = 2 * (in_block_bytes + out_block_bytes) + 2 * weight_bytes
    vmem_limit = int(min(_VMEM_CAP_BYTES, max(32 * 1024 * 1024, 2 * vmem_need)))

    flops = 2 * B * F * (N * F + N * E + F) + 2 * B * F * F
    bytes_accessed = (B * (N * F + N * E + F) * itemsize    # activation reads
                      + weight_bytes                        # weight reads
                      + B * F * 4)                          # z writes
    cost = pl.CostEstimate(flops=flops, transcendentals=0,
                           bytes_accessed=bytes_accessed)

    z = pl.pallas_call(
        kernel,
        out_shape=out_shape,
        grid=grid,
        in_specs=in_specs,
        out_specs=out_spec,
        compiler_params=pltpu.CompilerParams(
            dimension_semantics=("parallel",),
            vmem_limit_bytes=vmem_limit),
        cost_estimate=cost,
    )(*inputs)

    # Module returns (output, None) with output = (z, z_walk=None).
    return (z, None), None


def ref_forward(src, seq, seq_e, w1_t, b1, w2_t, b2):
    hn = jnp.concatenate([seq, seq_e], axis=2).mean(axis=1)
    x = jnp.concatenate([hn, src], axis=-1)
    h = jnp.maximum(x @ w1_t + b1, 0.0)
    return h @ w2_t + b2


if __name__ == "__main__":
    B, N = 8, 8
    feat_dim, edge_dim = 32, 16

    key = jax.random.PRNGKey(0)
    k_src, k_seq, k_seqe, k_w1, k_b1, k_w2, k_b2 = jax.random.split(key, 7)

    src = jax.random.normal(k_src, (B, feat_dim), dtype=jnp.float32)
    seq = jax.random.normal(k_seq, (B, N, feat_dim), dtype=jnp.float32)
    seq_e = jax.random.normal(k_seqe, (B, N, edge_dim), dtype=jnp.float32)
    # src_t / seq_t / mask are unused in this forward path (kept for API parity).
    mask = jnp.zeros((B, N), dtype=jnp.float32)

    d_in1 = (edge_dim + feat_dim) + feat_dim  # fc1 input dim
    # Deterministic "xavier-ish" init, stored transposed ([in, out]).
    w1_t = jax.random.normal(k_w1, (d_in1, feat_dim), dtype=jnp.float32) * 0.1
    b1 = jax.random.normal(k_b1, (feat_dim,), dtype=jnp.float32) * 0.1
    w2_t = jax.random.normal(k_w2, (feat_dim, feat_dim), dtype=jnp.float32) * 0.1
    b2 = jax.random.normal(k_b2, (feat_dim,), dtype=jnp.float32) * 0.1

    # Weight prep happens ONCE (module init), never per forward call.
    params = prepare_mean_pool_params(w1_t, b1, w2_t, b2, feat_dim, edge_dim, N)

    fwd = jax.jit(mean_pool_forward)
    (z, z_walk), _ = fwd(src, seq, seq_e, params)
    z = jax.block_until_ready(z)

    z_ref = jax.block_until_ready(
        ref_forward(src, seq, seq_e, w1_t, b1, w2_t, b2))
    # Kernel uses bf16 activations/weights (f32 accumulation) -> bf16 tolerance.
    np.testing.assert_allclose(np.asarray(z), np.asarray(z_ref),
                               rtol=3e-2, atol=3e-2)
    print("KERNEL_OK")
</pallas_src>

<mosaic_0001>
module attributes {stable_mosaic.version = 11 : i64} {
  func.func @_folded_kernel(%arg0: i32, %arg1: memref<8x256xbf16, #tpu.memory_space<vmem>>, %arg2: memref<8x128xbf16, #tpu.memory_space<vmem>>, %arg3: memref<8x32xbf16, #tpu.memory_space<vmem>>, %arg4: memref<416x32xbf16, #tpu.memory_space<vmem>>, %arg5: memref<2x32xf32, #tpu.memory_space<vmem>>, %arg6: memref<32x32xbf16, #tpu.memory_space<vmem>>, %arg7: memref<8x32xf32, #tpu.memory_space<vmem>>) attributes {dimension_semantics = [#tpu.dimension_semantics<parallel>], iteration_bounds = array<i64: 1>, scalar_prefetch = 0 : i64, scratch_operands = 0 : i64, tpu.core_type = #tpu.core_type<tc>, window_params = [{transform_indices = @transform_0, window_bounds = array<i64: 8, 256>}, {transform_indices = @transform_1, window_bounds = array<i64: 8, 128>}, {transform_indices = @transform_2, window_bounds = array<i64: 8, 32>}, {pipeline_mode = #tpu.pipeline_mode<synchronous>, transform_indices = @transform_3, window_bounds = array<i64: 416, 32>}, {pipeline_mode = #tpu.pipeline_mode<synchronous>, transform_indices = @transform_4, window_bounds = array<i64: 2, 32>}, {pipeline_mode = #tpu.pipeline_mode<synchronous>, transform_indices = @transform_5, window_bounds = array<i64: 32, 32>}, {transform_indices = @transform_6, window_bounds = array<i64: 8, 32>}]} {
    %c0 = arith.constant 0 : index
    %c0_0 = arith.constant 0 : index
    %0 = vector.load %arg1[%c0, %c0_0] : memref<8x256xbf16, #tpu.memory_space<vmem>>, vector<8x256xbf16>
    %c0_1 = arith.constant 0 : index
    %c0_2 = arith.constant 0 : index
    %1 = vector.load %arg4[%c0_1, %c0_2] : memref<416x32xbf16, #tpu.memory_space<vmem>>, vector<256x32xbf16>
    %cst = arith.constant dense<0.000000e+00> : vector<8x32xf32>
    %2 = tpu.matmul %0, %1, %cst {dimension_numbers = #tpu.dot_dimension_numbers<[1], [0], [0], [1], [0, 0, 1, 1], [], []>} : vector<8x256xbf16>, vector<256x32xbf16>, vector<8x32xf32> -> vector<8x32xf32>
    %c0_3 = arith.constant 0 : index
    %c0_4 = arith.constant 0 : index
    %3 = vector.load %arg2[%c0_3, %c0_4] : memref<8x128xbf16, #tpu.memory_space<vmem>>, vector<8x128xbf16>
    %c256 = arith.constant 256 : index
    %c0_5 = arith.constant 0 : index
    %4 = vector.load %arg4[%c256, %c0_5] : memref<416x32xbf16, #tpu.memory_space<vmem>>, vector<128x32xbf16>
    %cst_6 = arith.constant dense<0.000000e+00> : vector<8x32xf32>
    %5 = tpu.matmul %3, %4, %cst_6 {dimension_numbers = #tpu.dot_dimension_numbers<[1], [0], [0], [1], [0, 0, 1, 1], [], []>} : vector<8x128xbf16>, vector<128x32xbf16>, vector<8x32xf32> -> vector<8x32xf32>
    %6 = arith.addf %2, %5 : vector<8x32xf32>
    %c0_7 = arith.constant 0 : index
    %c0_8 = arith.constant 0 : index
    %7 = vector.load %arg3[%c0_7, %c0_8] : memref<8x32xbf16, #tpu.memory_space<vmem>>, vector<8x32xbf16>
    %c384 = arith.constant 384 : index
    %c0_9 = arith.constant 0 : index
    %8 = vector.load %arg4[%c384, %c0_9] : memref<416x32xbf16, #tpu.memory_space<vmem>>, vector<32x32xbf16>
    %cst_10 = arith.constant dense<0.000000e+00> : vector<8x32xf32>
    %9 = tpu.matmul %7, %8, %cst_10 {dimension_numbers = #tpu.dot_dimension_numbers<[1], [0], [0], [1], [0, 0, 1, 1], [], []>} : vector<8x32xbf16>, vector<32x32xbf16>, vector<8x32xf32> -> vector<8x32xf32>
    %10 = arith.addf %6, %9 : vector<8x32xf32>
    %c0_11 = arith.constant 0 : index
    %c0_12 = arith.constant 0 : index
    %11 = vector.load %arg5[%c0_11, %c0_12] : memref<2x32xf32, #tpu.memory_space<vmem>>, vector<1x32xf32>
    %12 = vector.broadcast %11 : vector<1x32xf32> to vector<8x32xf32>
    %13 = arith.addf %10, %12 : vector<8x32xf32>
    %cst_13 = arith.constant 0.000000e+00 : f32
    %14 = vector.broadcast %cst_13 : f32 to vector<8x32xf32>
    %15 = arith.maximumf %13, %14 : vector<8x32xf32>
    %16 = arith.truncf %15 : vector<8x32xf32> to vector<8x32xbf16>
    %c0_14 = arith.constant 0 : index
    %c0_15 = arith.constant 0 : index
    %17 = vector.load %arg6[%c0_14, %c0_15] : memref<32x32xbf16, #tpu.memory_space<vmem>>, vector<32x32xbf16>
    %cst_16 = arith.constant dense<0.000000e+00> : vector<8x32xf32>
    %18 = tpu.matmul %16, %17, %cst_16 {dimension_numbers = #tpu.dot_dimension_numbers<[1], [0], [0], [1], [0, 0, 1, 1], [], []>} : vector<8x32xbf16>, vector<32x32xbf16>, vector<8x32xf32> -> vector<8x32xf32>
    %c1 = arith.constant 1 : index
    %c0_17 = arith.constant 0 : index
    %19 = vector.load %arg5[%c1, %c0_17] : memref<2x32xf32, #tpu.memory_space<vmem>>, vector<1x32xf32>
    %20 = vector.broadcast %19 : vector<1x32xf32> to vector<8x32xf32>
    %21 = arith.addf %18, %20 : vector<8x32xf32>
    %c0_18 = arith.constant 0 : index
    %c0_19 = arith.constant 0 : index
    %22 = vector.load %arg7[%c0_18, %c0_19] : memref<8x32xf32, #tpu.memory_space<vmem>>, vector<8x32xf32>
    tpu.vector_store %arg7[%c0_18, %c0_19], %21 {strides = array<i32>} : memref<8x32xf32, #tpu.memory_space<vmem>>, vector<8x32xf32>,
    return
  }
  func.func @transform_0(%arg0: i32) -> (i32, i32) {
    %c0_i32 = arith.constant 0 : i32
    %c0_i32_0 = arith.constant 0 : i32
    return %arg0, %c0_i32 : i32, i32
  }
  func.func @transform_1(%arg0: i32) -> (i32, i32) {
    %c0_i32 = arith.constant 0 : i32
    %c0_i32_0 = arith.constant 0 : i32
    return %arg0, %c0_i32 : i32, i32
  }
  func.func @transform_2(%arg0: i32) -> (i32, i32) {
    %c0_i32 = arith.constant 0 : i32
    %c0_i32_0 = arith.constant 0 : i32
    return %arg0, %c0_i32 : i32, i32
  }
  func.func @transform_3(%arg0: i32) -> (i32, i32) {
    %c0_i32 = arith.constant 0 : i32
    %c0_i32_0 = arith.constant 0 : i32
    %c0_i32_1 = arith.constant 0 : i32
    return %c0_i32, %c0_i32_0 : i32, i32
  }
  func.func @transform_4(%arg0: i32) -> (i32, i32) {
    %c0_i32 = arith.constant 0 : i32
    %c0_i32_0 = arith.constant 0 : i32
    %c0_i32_1 = arith.constant 0 : i32
    return %c0_i32, %c0_i32_0 : i32, i32
  }
  func.func @transform_5(%arg0: i32) -> (i32, i32) {
    %c0_i32 = arith.constant 0 : i32
    %c0_i32_0 = arith.constant 0 : i32
    %c0_i32_1 = arith.constant 0 : i32
    return %c0_i32, %c0_i32_0 : i32, i32
  }
  func.func @transform_6(%arg0: i32) -> (i32, i32) {
    %c0_i32 = arith.constant 0 : i32
    %c0_i32_0 = arith.constant 0 : i32
    return %arg0, %c0_i32 : i32, i32
  }
}

</mosaic_0001>

<bundles_post_ra>
// kernel: mean_pool_forward.1
= control target key start
LH: loop header
LB: loop body
LE: loop exit
PB: predicated region body
PF: predicated region fallthrough
CT: control target
= control target key end

     0   :  { %v617_v1 = vmov 0.0   ;;  %vm618_vm0 = vmmov 0   ;;  %s778_s0 = inlined_call_operand.vmem [shape: bf16[8,256], index: 0, kind: input, shape index: {}]   ;;  %s779_s1 = inlined_call_operand.vmem [shape: bf16[8,128], index: 1, kind: input, shape index: {}]   ;;  %s780_s2 = inlined_call_operand.vmem [shape: bf16[8,32], index: 2, kind: input, shape index: {}]   ;;  %s781_s3 = inlined_call_operand.vmem [shape: bf16[416,32], index: 3, kind: input, shape index: {}]   ;;  %s782_s4 = inlined_call_operand.vmem [shape: f32[2,32], index: 4, kind: input, shape index: {}]   ;;  %s783_s5 = inlined_call_operand.vmem [shape: bf16[32,32], index: 5, kind: input, shape index: {}]   ;;  %s784_s6 = inlined_call_operand.hbm [shape: f32[8,32], index: 6, kind: output, shape index: {}]  }
   0x1   :  { %v565_v0 = vld [vmem:[%s781_s3 + $0xb8] sm:$0xff]   ;;  %526 = vmatprep.subr.bf16.mxu0 %v617_v1  ;;  %542 = vmatprep.mubr.msk.bf16.mxu0 %vm618_vm0, %v617_v1  ;;  %v568_v4 = vld [vmem:[%s781_s3 + $0xb0] sm:$0xff]   ;;  %v571_v7 = vld [vmem:[%s781_s3 + $0xa8] sm:$0xff]  }
   0x2   :  { %v566_v2 = vld [vmem:[%s781_s3 + $0x78] sm:$0xff]   ;;  %527 = vmatpush3.bf16.msra.mxu0 %v565_v0  ;;  %v569_v5 = vld [vmem:[%s781_s3 + $0x70] sm:$0xff]   ;;  %v572_v8 = vld [vmem:[%s781_s3 + $0x68] sm:$0xff]  }
   0x3   :  { %v567_v3 = vld [vmem:[%s781_s3 + $0x38] sm:$0xff]   ;;  %498 = vmatprep.subr.bf16.mxu1 %v566_v2  ;;  %528 = vmatprep.subr.bf16.mxu0 %v617_v1  ;;  %v570_v6 = vld [vmem:[%s781_s3 + $0x30] sm:$0xff]   ;;  %v573_v9 = vld [vmem:[%s781_s3 + $0x28] sm:$0xff]  }
   0x4   :  { %499 = vmatpush3.bf16.msra.mxu1 %v567_v3  ;;  %v574_v10 = vld [vmem:[%s781_s3 + $0xa0] sm:$0xff]   ;;  %v578_v13 = vld [vmem:[%s781_s3 + $0x58] sm:$0xff]   ;;  %v581_v16 = vld [vmem:[%s781_s3 + $0x50] sm:$0xff]  }
   0x5   :  { %500 = vmatprep.subr.bf16.mxu1 %v569_v5  ;;  %v575_v11 = vld [vmem:[%s781_s3 + $0x60] sm:$0xff]   ;;  %v577_v14 = vld [vmem:[%s781_s3 + $0x98] sm:$0xff]   ;;  %v580_v17 = vld [vmem:[%s781_s3 + $0x90] sm:$0xff]  }
   0x6   :  { %529 = vmatpush3.bf16.msra.mxu0 %v568_v4  ;;  %v576_v12 = vld [vmem:[%s781_s3 + $0x20] sm:$0xff]   ;;  %v579_v15 = vld [vmem:[%s781_s3 + $0x18] sm:$0xff]   ;;  %v582_v18 = vld [vmem:[%s781_s3 + $0x10] sm:$0xff]  }
   0x7   :  { %530 = vmatprep.subr.bf16.mxu0 %v617_v1  ;;  %v584_v19 = vld [vmem:[%s781_s3 + $0x48] sm:$0xff]   ;;  %v25_v22 = vld [vmem:[%s778_s0] sm:$0xff] }
   0x8   :  { %501 = vmatpush3.bf16.msra.mxu1 %v570_v6  ;;  %v583_v20 = vld [vmem:[%s781_s3 + $0x88] sm:$0xff]   ;;  %v587_v23 = vld [vmem:[%s781_s3 + $0x40] sm:$0xff]   ;;  %v464_v24 = vcombine.high %v25_v22, %v25_v22 }
   0x9   :  { %502 = vmatprep.subr.bf16.mxu1 %v572_v8  ;;  %v585_v21 = vld [vmem:[%s781_s3 + $0x8] sm:$0xff]   ;;  %v586_v25 = vld [vmem:[%s781_s3 + $0x80] sm:$0xff]  }
   0xa   :  { %531 = vmatpush3.bf16.msra.mxu0 %v571_v7  ;;  %298 = vmatprep.mubr.bf16.mxu1 %v464_v24  ;;  %v588_v26 = vld [vmem:[%s781_s3] sm:$0xff]  }
   0xb   :  { %532 = vmatprep.subr.bf16.mxu0 %v617_v1 }
   0xc   :  { %503 = vmatpush3.bf16.msra.mxu1 %v573_v9 }
   0xd   :  { %504 = vmatprep.subr.bf16.mxu1 %v575_v11 }
   0xe   :  { %533 = vmatpush3.bf16.msra.mxu0 %v574_v10 }
   0xf   :  { %534 = vmatprep.subr.bf16.mxu0 %v617_v1 }
  0x10   :  { %505 = vmatpush3.bf16.msra.mxu1 %v576_v12 }
  0x11   :  { %506 = vmatprep.subr.bf16.mxu1 %v578_v13 }
  0x12   :  { %535 = vmatpush3.bf16.msra.mxu0 %v577_v14 }
  0x13   :  { %536 = vmatprep.subr.bf16.mxu0 %v617_v1 }
  0x14   :  { %507 = vmatpush3.bf16.msra.mxu1 %v579_v15 }
  0x15   :  { %508 = vmatprep.subr.bf16.mxu1 %v581_v16 }
  0x16   :  { %537 = vmatpush3.bf16.msra.mxu0 %v580_v17 }
  0x17   :  { %538 = vmatprep.subr.bf16.mxu0 %v617_v1 }
  0x18   :  { %509 = vmatpush3.bf16.msra.mxu1 %v582_v18 }
  0x19   :  { %510 = vmatprep.subr.bf16.mxu1 %v584_v19 }
  0x1a   :  { %539 = vmatpush3.bf16.msra.mxu0 %v583_v20 }
  0x1b   :  { %540 = vmatprep.subr.bf16.mxu0 %v617_v1 }
  0x1c   :  { %511 = vmatpush3.bf16.msra.mxu1 %v585_v21 }
  0x1d   :  { %11 = vsyncpa [#allocation3], 0  ;;  %512 = vmatprep.subr.bf16.mxu1 %v587_v23  ;;  %v58_v27 = vld [vmem:[%s779_s1] sm:$0xf]  ;;  %v591_v28 = vld [vmem:[%s781_s3 + $0xc8] sm:$0xff]   ;;  %v463_v29 = vcombine.low %v25_v22, %v25_v22  ;;  %vm323_vm1 = vcmask 261120  }
  0x1e   :  { %541 = vmatpush3.bf16.msra.mxu0 %v586_v25  ;;  %v592_v30 = vld [vmem:[%s781_s3 + $0xc0] sm:$0xff]   ;;  %v593_v32 = vld [vmem:[%s783_s5 + $0x8] sm:$0xff]   ;;  %s619_s10 = smov [#allocation2]  }
  0x1f   :  { %546 = vmatprep.subr.bf16.mxu0 %v617_v1  ;;  %v306_v31 = vld [vmem:[%s780_s2] sm:$0xf]  ;;  %s447_s11 = sshll.u32 %s619_s10, 4  ;;  %s448_s11 = int_to_ptr.vmem [resolvable:$true] %s447_s11 }
  0x20   :  { %513 = vmatpush3.bf16.msra.mxu1 %v588_v26  ;;  %v594_v33 = vld [vmem:[%s783_s5] sm:$0xff]   ;;  %s595_s12 = scalar_lea.vmem %s448_s11, 128  ;;  %p600_p1 = scmp.lt.s32.totalorder %s448_s11, %s448_s11 }
  0x21   :  { %543 = vmatmul.mubr.bf16.vlgmr.msra.gmra.mxu0 %v58_v27  ;;  %554 = vmatprep.subr.bf16.mxu1 %v617_v1  ;;  %v484_v45 = vld [vmem:[%s782_s4] ss:$0 sm:$0xff]  ;;  %v485_v53 = vld [vmem:[%s782_s4 + $0x1] ss:$0 sm:$0xff]  ;;  %p596_p0 = scmp.ne.s32.totalorder %s448_s11, %s595_s12  ;;  %p601_p2 = scmp.lt.s32.totalorder %s595_s12, %s595_s12 }
  0x22   :  { %547 = vmatpush3.bf16.msra.mxu0 %v591_v28  ;;  %550 = vmatprep.mubr.msk.bf16.mxu0 %vm618_vm0, %v617_v1 }
  0x23   :  { %299 = vmatmul.mubr.bf16.vlgmr.msra.gmra.mxu1 %v463_v29  ;;  %548 = vmatprep.subr.bf16.mxu0 %v617_v1  ;;  %p602_p3 = por %p601_p2, %p600_p1 }
  0x24   :  { %558 = vmatprep.mubr.msk.bf16.mxu1 %vm618_vm0, %v617_v1  ;;  %555 = vmatpush3.bf16.msra.mxu1 %v593_v32 }
  0x25   :  { %556 = vmatprep.subr.bf16.mxu1 %v617_v1  ;;  %p603_p4 = pnand %p602_p3, %p596_p0 }
  0x26   :  { %549 = vmatpush3.bf16.msra.mxu0 %v592_v30 }
  0x28   :  { %557 = vmatpush3.bf16.msra.mxu1 %v594_v33 }
  0x29   :  { %551 = vmatmul.mubr.msk.bf16.vlgmr.msra.gmra.mxu0 %vm323_vm1, %v306_v31 }
  0xe1   :  { %v157_v34 = vpop.f32.mrf.mxu0 }
  0xe3   :  { %v514_v35 = vpop.f32.mrf.mxu1  ;;  %v544_v36 = vpop.f32.mrf.mxu0 }
  0xe5   :  { %v515_v37 = vpop.f32.mrf.mxu1  ;;  %v160_v38 = vpop.f32.mrf.mxu0 }
  0xe6   :  { %v516_v39 = vadd.f32 %v515_v37, %v514_v35 }
  0xe7   :  { %v517_v40 = vpop.f32.mrf.mxu1  ;;  %v545_v41 = vpop.f32.mrf.mxu0 }
  0xe8   :  { %v301_v42 = vadd.f32 %v516_v39, %v157_v34 }
  0xe9   :  { %v518_v43 = vpop.f32.mrf.mxu1  ;;  %v361_v44 = vpop.f32.mrf.mxu0 }
  0xea   :  { %v367_v46 = vadd.f32 %v361_v44, %v301_v42 }
  0xeb   :  { %v552_v47 = vpop.f32.mrf.mxu0 }
  0xec   :  { %v373_v48 = vadd.f32 %v484_v45, %v367_v46 }
  0xed   :  { %v364_v49 = vpop.f32.mrf.mxu0 }
  0xee   :  { %v374_v50 = vmax.f32 %v373_v48, 0.0 }
  0xef   :  { %v553_v51 = vpop.f32.mrf.mxu0 }
  0xf0   :  { %v375_v52 = vpack.c.bf16 %v374_v50, %v374_v50 }
  0xf2   :  { %559 = vmatmul.mubr.msk.bf16.vlgmr.msra.gmra.mxu1 %vm323_vm1, %v375_v52 }
 0x1b2   :  { %v434_v54 = vpop.f32.mrf.mxu1 }
 0x1b3   :  { %v435_v55 = vadd.f32 %v485_v53, %v434_v54 }
 0x1b4   :  { %v560_v56 = vpop.f32.mrf.mxu1 }
 0x1b5   :  { %440 = vst.msk [vmem:[#allocation2] sm:$0xff] %vm323_vm1, %v435_v55 }
 0x1b6   :  { %v437_v57 = vpop.f32.mrf.mxu1 }
 0x1b7   :  { %606 = shalt.err (!%p603_p4)
}
 0x1b8   :  { %450 = dma.vmem_to_hbm [thread:$0]  %s448_s11, 128, %s784_s6, [#allocation3]   ;;  %v561_v58 = vpop.f32.mrf.mxu1 }
 0x1b9   :  { %615 = dma.done.wait [#allocation3], 128  }
 0x1ba   :  { %616 = vsyncadd [#allocation3], 4294967168 }
 0x1bb   :  { %454 = vsyncpa [#allocation3], 1 }

</bundles_post_ra>
